<compile_context>
chip_gen: v5e
topology: v5e:2x2
jax: 0.10.0
libtpu: 0.0.40
codegen_flags: <defaults>
</compile_context>

<pallas_src>
import math

import jax
import jax.numpy as jnp
from jax.experimental import pallas as pl
from jax.experimental.pallas import tpu as pltpu


def _make_pe(d_model: int, max_len: int = 5000) -> jnp.ndarray:
    """Deterministic buffer, mirrors PositionalEncoding.__init__ (odd d_model guarded)."""
    position = jnp.arange(0, max_len, dtype=jnp.float32)[:, None]            # (max_len, 1)
    div_term = jnp.exp(
        jnp.arange(0, d_model, 2, dtype=jnp.float32) * (-math.log(10000.0) / d_model)
    )                                                                        # (ceil(d/2),)
    angles = position * div_term                                             # (max_len, ceil(d/2))
    pe = jnp.zeros((max_len, d_model), dtype=jnp.float32)
    pe = pe.at[:, 0::2].set(jnp.sin(angles))
    pe = pe.at[:, 1::2].set(jnp.cos(angles)[:, : d_model // 2])
    return pe[None, :, :]                                                    # (1, max_len, d_model)


def _pe_add_kernel(x_ref, pe_ref, o_ref):
    # x_ref/o_ref: (tb, tr, C); pe_ref: (1, tr, C) broadcast across the batch block.
    # Pure VPU add; all the performance lives in the DMA / layout around this body.
    o_ref[...] = (x_ref[...] + pe_ref[...]).astype(o_ref.dtype)


def _choose_lane_layout(seq_len: int, d_model: int, max_lanes: int = 2048):
    """Factor seq_len*d_model into (rows, lanes) with lanes a multiple of 128
    (unmasked stores).  Falls back to (seq_len, d_model) if not possible."""
    flat = seq_len * d_model
    if flat % 128 == 0:
        c = (min(max_lanes, flat) // 128) * 128
        while c >= 128:
            if flat % c == 0:
                return flat // c, c
            c -= 128
    # Lane-sparse fallback: last dim equals the full array dim, which is legal.
    return seq_len, d_model


def _pallas_add(x3, pe3, tb, tr, *, vmem_limit_bytes, cost_estimate):
    """x3: (B, R, C); pe3: (1, P, C) with P >= R.  Returns x3 + pe3[:, :R]."""
    B, R, C = x3.shape
    grid = (pl.cdiv(R, tr), pl.cdiv(B, tb))   # batch innermost -> pe tile stays resident
    return pl.pallas_call(
        _pe_add_kernel,
        out_shape=jax.ShapeDtypeStruct((B, R, C), x3.dtype),
        grid_spec=pltpu.PrefetchScalarGridSpec(
            num_scalar_prefetch=0,
            grid=grid,
            in_specs=[
                pl.BlockSpec((tb, tr, C), lambda r, b: (b, r, 0)),   # x tile
                pl.BlockSpec((1, tr, C), lambda r, b: (0, r, 0)),    # pe tile (batch-broadcast)
            ],
            out_specs=pl.BlockSpec((tb, tr, C), lambda r, b: (b, r, 0)),
        ),
        compiler_params=pltpu.CompilerParams(
            dimension_semantics=("parallel", "parallel"),
            vmem_limit_bytes=vmem_limit_bytes,
        ),
        cost_estimate=cost_estimate,
    )(x3, pe3)


def positional_encoding_forward(
    x: jnp.ndarray,
    pe: jnp.ndarray,
    *,
    target_block_bytes: int = 4 * 1024 * 1024,   # ~4 MiB per x tile (v7x-friendly; fine on v5e/v6e)
    vmem_limit_bytes: int = 48 * 1024 * 1024,    # < 64 MiB physical on v7x; load-bearing on v5e
    xla_fallback_elems: int = 1 << 20,           # tiny inputs: fused XLA add beats pallas_call cost
) -> jnp.ndarray:
    """out = x + pe[:, :S].  x: (B, S, D); pe: (1, max_len, D)."""
    B, S, D = x.shape
    out_dtype = jnp.promote_types(x.dtype, pe.dtype)   # torch promotion semantics

    if B * S * D < xla_fallback_elems:
        return x.astype(out_dtype) + pe[:, :S, :].astype(out_dtype)

    x = x.astype(out_dtype)      # no-op in the common (all-f32 / all-bf16) case
    pe = pe.astype(out_dtype)    # no-op in the common case
    itemsize = jnp.dtype(out_dtype).itemsize
    sub = max(8, 32 // itemsize)                 # packed sublane tile: 8 f32 / 16 bf16 / 32 int8

    cost = pl.CostEstimate(
        flops=B * S * D,
        transcendentals=0,
        bytes_accessed=(2 * B + 1) * S * D * itemsize,
    )

    if D % 128 == 0 and S >= sub:
        # --- Fast path: natural layout, pe buffer indexed directly (zero-copy). ---
        rows_target = max(1, target_block_bytes // (D * itemsize))
        tr = max(sub, (min(rows_target, S) // sub) * sub)       # multiple of sub, <= S
        tb = min(B, max(1, rows_target // S)) if tr == S else 1 # batch-block small slabs
        return _pallas_add(x, pe, tb, tr,
                           vmem_limit_bytes=vmem_limit_bytes, cost_estimate=cost)

    # --- Fallback path: lane-dense re-layout (small / odd D). ---
    pe_s = pe[:, :S, :]                          # static slice of the registered buffer
    R, C = _choose_lane_layout(S, D)
    x3 = x.reshape(B, R, C)
    pe3 = pe_s.reshape(1, R, C)
    rows_target = max(1, target_block_bytes // (C * itemsize))
    if rows_target >= R:
        tr = R                                   # full extent: always a legal block dim here
        tb = min(B, max(1, rows_target // max(R, 1)))
    else:
        tr = min(R, max(sub, (rows_target // sub) * sub))
        tb = 1
    out3 = _pallas_add(x3, pe3, tb, tr,
                       vmem_limit_bytes=vmem_limit_bytes, cost_estimate=cost)

    # TODO(synk): further win — synthesize pe in-kernel (iota position x prefetched
    # div_term + EUP sin/cos into a persistent VMEM scratch, batch axis "arbitrary")
    # to remove the pe HBM read stream entirely (~20% traffic at B=2).
    return out3.reshape(B, S, D)


if __name__ == "__main__":
    MAX_LEN = 5000
    key = jax.random.PRNGKey(0)
    k0, k1, k2 = jax.random.split(key, 3)

    # 1) Canonical small shape from the module (batch=2, seq=8, d_model=32).
    #    xla_fallback_elems=0 forces the Pallas path so the kernel itself is exercised.
    B, S, D = 2, 8, 32
    x = jax.random.normal(k0, (B, S, D), dtype=jnp.float32)
    pe = _make_pe(D, MAX_LEN)
    out = jax.block_until_ready(positional_encoding_forward(x, pe, xla_fallback_elems=0))
    ref = x + pe[:, :S, :]
    assert out.shape == (B, S, D)
    assert jnp.allclose(out, ref, atol=1e-6), "mismatch (small / lane-relayout path)"

    # 2) D % 128 == 0 fast path: natural layout, pe buffer indexed directly,
    #    multi-tile grid over (seq, batch).  Small target_block_bytes just to
    #    exercise the tiling; defaults are used in production.
    B2, S2, D2 = 2, 256, 256
    x2 = jax.random.normal(k1, (B2, S2, D2), dtype=jnp.float32)
    pe2 = _make_pe(D2, MAX_LEN)
    out2 = jax.block_until_ready(
        positional_encoding_forward(x2, pe2, target_block_bytes=64 * 1024,
                                    xla_fallback_elems=0))
    ref2 = x2 + pe2[:, :S2, :]
    assert out2.shape == (B2, S2, D2)
    assert jnp.allclose(out2, ref2, atol=1e-6), "mismatch (natural-layout path)"

    # 3) Odd d_model -> lane-dense re-layout with a partial last row block.
    B3, S3, D3 = 2, 384, 257
    x3 = jax.random.normal(k2, (B3, S3, D3), dtype=jnp.float32)
    pe3 = _make_pe(D3, MAX_LEN)
    out3 = jax.block_until_ready(
        positional_encoding_forward(x3, pe3, target_block_bytes=128 * 1024,
                                    xla_fallback_elems=0))
    ref3 = x3 + pe3[:, :S3, :]
    assert out3.shape == (B3, S3, D3)
    assert jnp.allclose(out3, ref3, atol=1e-6), "mismatch (odd-D re-layout path)"

    print("KERNEL_OK")
</pallas_src>

<mosaic_0001>
module attributes {stable_mosaic.version = 11 : i64} {
  func.func @_pe_add_kernel(%arg0: i32, %arg1: i32, %arg2: memref<2x1x256xf32, #tpu.memory_space<vmem>>, %arg3: memref<1x1x256xf32, #tpu.memory_space<vmem>>, %arg4: memref<2x1x256xf32, #tpu.memory_space<vmem>>) attributes {dimension_semantics = [#tpu.dimension_semantics<parallel>, #tpu.dimension_semantics<parallel>], iteration_bounds = array<i64: 1, 1>, scalar_prefetch = 0 : i64, scratch_operands = 0 : i64, tpu.core_type = #tpu.core_type<tc>, window_params = [{transform_indices = @transform_0, window_bounds = array<i64: 2, 1, 256>}, {transform_indices = @transform_1, window_bounds = array<i64: 1, 1, 256>}, {transform_indices = @transform_2, window_bounds = array<i64: 2, 1, 256>}]} {
    %c0 = arith.constant 0 : index
    %c0_0 = arith.constant 0 : index
    %c0_1 = arith.constant 0 : index
    %0 = vector.load %arg2[%c0, %c0_0, %c0_1] : memref<2x1x256xf32, #tpu.memory_space<vmem>>, vector<2x1x256xf32>
    %c0_2 = arith.constant 0 : index
    %c0_3 = arith.constant 0 : index
    %c0_4 = arith.constant 0 : index
    %1 = vector.load %arg3[%c0_2, %c0_3, %c0_4] : memref<1x1x256xf32, #tpu.memory_space<vmem>>, vector<1x1x256xf32>
    %2 = vector.broadcast %1 : vector<1x1x256xf32> to vector<2x1x256xf32>
    %3 = arith.addf %0, %2 : vector<2x1x256xf32>
    %c0_5 = arith.constant 0 : index
    %c0_6 = arith.constant 0 : index
    %c0_7 = arith.constant 0 : index
    %4 = vector.load %arg4[%c0_5, %c0_6, %c0_7] : memref<2x1x256xf32, #tpu.memory_space<vmem>>, vector<2x1x256xf32>
    tpu.vector_store %arg4[%c0_5, %c0_6, %c0_7], %3 {strides = array<i32>} : memref<2x1x256xf32, #tpu.memory_space<vmem>>, vector<2x1x256xf32>,
    return
  }
  func.func @transform_0(%arg0: i32, %arg1: i32) -> (i32, i32, i32) {
    %c0_i32 = arith.constant 0 : i32
    %c0_i32_0 = arith.constant 0 : i32
    return %arg1, %arg0, %c0_i32 : i32, i32, i32
  }
  func.func @transform_1(%arg0: i32, %arg1: i32) -> (i32, i32, i32) {
    %c0_i32 = arith.constant 0 : i32
    %c0_i32_0 = arith.constant 0 : i32
    %c0_i32_1 = arith.constant 0 : i32
    return %c0_i32, %arg0, %c0_i32_0 : i32, i32, i32
  }
  func.func @transform_2(%arg0: i32, %arg1: i32) -> (i32, i32, i32) {
    %c0_i32 = arith.constant 0 : i32
    %c0_i32_0 = arith.constant 0 : i32
    return %arg1, %arg0, %c0_i32 : i32, i32, i32
  }
}

</mosaic_0001>

<bundles_post_ra>
// kernel: tpu_custom_call.1
= control target key start
LH: loop header
LB: loop body
LE: loop exit
PB: predicated region body
PF: predicated region fallthrough
CT: control target
= control target key end

     0   :  { %7 = vsyncpa [#allocation3], 0  ;;  %s185_s0 = inlined_call_operand.hbm [shape: f32[2,1,256], index: 0, kind: input, shape index: {}]   ;;  %s186_s1 = inlined_call_operand.hbm [shape: f32[1,1,256], index: 1, kind: input, shape index: {}]   ;;  %s187_s2 = inlined_call_operand.hbm [shape: f32[2,1,256], index: 2, kind: output, shape index: {}]  }
   0x1   :  { %8 = vsyncpa [#allocation6], 0 }
   0x2   :  { %9 = vsyncpa [#allocation4], 0  ;;  %s14_s11 = sshll.u32 %s185_s0, 4  ;;  %s156_s12 = smov [#allocation2]   ;;  %s15_s11 = int_to_ptr.hbm [resolvable:$true] %s14_s11 }
   0x3   :  { %s16_s13 = sshll.u32 %s156_s12, 4  ;;  %s28_s16 = sshll.u32 %s186_s1, 4  ;;  %s17_s13 = int_to_ptr.vmem [resolvable:$true] %s16_s13  ;;  %s29_s16 = int_to_ptr.hbm [resolvable:$true] %s28_s16 }
   0x4   :  { %s157_s17 = smov 32   ;;  %s158_s18 = smov 2  }
   0x5   :  { %22 = dma.hbm_to_vmem [thread:$0]  %s15_s11, 64, %s17_s13, [#allocation3], %s157_s17, %s157_s17, %s158_s18  }
   0x6   :  { %s159_s19 = smov [#allocation5]  }
   0x7   :  { %s30_s20 = sshll.u32 %s159_s19, 4  ;;  %s31_s20 = int_to_ptr.vmem [resolvable:$true] %s30_s20 }
   0x8   :  { %33 = dma.hbm_to_vmem [thread:$0]  %s29_s16, 32, %s31_s20, [#allocation6]  }
   0x9   :  { %150 = dma.done.wait [#allocation3], 64  }
   0xa   :  { %151 = vsyncadd [#allocation3], 4294967232 }
   0xb   :  { %152 = dma.done.wait [#allocation6], 32  }
   0xc   :  { %153 = vsyncadd [#allocation6], 4294967264  ;;  %v47_v0 = vlaneseq  ;;  %s160_s0 = smov [#allocation7]   ;;  %s59_s1 = sshll.u32 %s187_s2, 4  ;;  %v42_v1 = vld [vmem:[#allocation2] sm:$0x3]  ;;  %s60_s1 = int_to_ptr.hbm [resolvable:$true] %s59_s1 }
   0xd   :  { %s57_s21 = sshll.u32 %s160_s0, 4  ;;  %v44_v2 = vld [vmem:[#allocation5] sm:$0x3]  ;;  %v43_v3 = vld [vmem:[#allocation2 + $0x2] sm:$0x3]  ;;  %s58_s21 = int_to_ptr.vmem [resolvable:$true] %s57_s21 }
   0xe   :  { %vm49_vm0 = vcmp.lt.s32.totalorder %v47_v0, 256  ;;  %v45_v4 = vadd.f32 %v44_v2, %v42_v1  ;;  %v46_v5 = vadd.f32 %v44_v2, %v43_v3 }
  0x10   :  { %51 = vst.msk [vmem:[#allocation7] sm:$0x3] %vm49_vm0, %v45_v4 }
  0x11   :  { %52 = vst.msk [vmem:[#allocation7 + $0x2] sm:$0x3] %vm49_vm0, %v46_v5 }
  0x12   :  { %65 = dma.vmem_to_hbm [thread:$0]  %s58_s21, 64, %s60_s1, [#allocation4], %s157_s17, %s157_s17, %s158_s18  }
  0x13   :  { %154 = dma.done.wait [#allocation4], 64  }
  0x14   :  { %155 = vsyncadd [#allocation4], 4294967232 }
  0x15   :  { %70 = vsyncpa [#allocation3], 1 }
  0x16   :  { %71 = vsyncpa [#allocation6], 1 }
  0x17   :  { %72 = vsyncpa [#allocation4], 1 }

</bundles_post_ra>
